<compile_context>
chip_gen: v7x
topology: tpu7x:2x2x1
jax: 0.10.0
libtpu: 0.0.40
codegen_flags: <defaults>
</compile_context>

<pallas_src>
import jax
import jax.numpy as jnp
from jax.experimental import pallas as pl
from jax.experimental.pallas import tpu as pltpu

HIDDEN = 64        # logical hidden width (nn.Linear(..., 64))
HIDDEN_PAD = 128   # lane-padded hidden width
LANE = 128


def _round_up(x, m):
    return (x + m - 1) // m * m


# --------------------------------------------------------------------------
# Kernel
# --------------------------------------------------------------------------
def policy_mlp_kernel(x_ref, w1_ref, w23_ref, b_ref, o_ref):
    """Fused 3-layer MLP on one batch tile.

    x_ref:   [TB, S]        f32  (raw state tile; cast to bf16 in-kernel)
    w1_ref:  [S, 128]       bf16 (fc1 weight, lane-padded out dim, resident)
    w23_ref: [256, 128]     bf16 (fc2 ; fc3 stacked on sublanes, resident)
    b_ref:   [1, 384]       f32  (b1 | b2 | b3 packed on lanes, resident)
    o_ref:   [TB, 128]      bf16 (lane-padded logits; cols A..127 are 0.0)
    """
    # VPU cast: f32 state -> bf16 MXU operand (no wrapper pad/cast pass).
    x = x_ref[...].astype(jnp.bfloat16)

    # Static, tile-aligned slices of the packed parameter slabs (zero cost).
    w1 = w1_ref[...]
    w2 = w23_ref[0:HIDDEN_PAD, :]
    w3 = w23_ref[HIDDEN_PAD:2 * HIDDEN_PAD, :]
    b1 = b_ref[:, 0:LANE]
    b2 = b_ref[:, LANE:2 * LANE]
    b3 = b_ref[:, 2 * LANE:3 * LANE]

    # fc1 + ReLU  (bf16 MXU operands, f32 accumulate, f32 epilogue)
    h1 = jnp.dot(x, w1, preferred_element_type=jnp.float32) + b1
    h1 = jnp.maximum(h1, 0.0).astype(jnp.bfloat16)
    # fc2 + ReLU
    h2 = jnp.dot(h1, w2, preferred_element_type=jnp.float32) + b2
    h2 = jnp.maximum(h2, 0.0).astype(jnp.bfloat16)
    # fc3 (logits, no activation) — full 128-lane unmasked bf16 store.
    logits = jnp.dot(h2, w3, preferred_element_type=jnp.float32) + b3
    o_ref[...] = logits.astype(o_ref.dtype)


# --------------------------------------------------------------------------
# Parameter packing (run ONCE at init, not per forward call)
# --------------------------------------------------------------------------
def pack_params(params):
    """Zero-pad to lane-dense shapes and cast weights to bf16.

    Returns a dict of device arrays:
      w1:  [S, 128]   bf16
      w23: [256, 128] bf16  (fc2 rows 0..127, fc3 rows 128..255)
      b:   [1, 384]   f32   (b1 | b2 | b3)
    """
    S, H = params["w1"].shape
    A = params["w3"].shape[1]
    assert H <= HIDDEN_PAD, f"hidden {H} > {HIDDEN_PAD} unsupported"
    assert params["w2"].shape[1] <= HIDDEN_PAD
    assert A <= HIDDEN_PAD, f"action_size {A} > {HIDDEN_PAD} unsupported"

    def pad_w(w, rows, cols):
        out = jnp.zeros((rows, cols), jnp.float32)
        return out.at[:w.shape[0], :w.shape[1]].set(w)

    w1 = pad_w(params["w1"], S, HIDDEN_PAD).astype(jnp.bfloat16)
    w2 = pad_w(params["w2"], HIDDEN_PAD, HIDDEN_PAD)
    w3 = pad_w(params["w3"], HIDDEN_PAD, HIDDEN_PAD)
    w23 = jnp.concatenate([w2, w3], axis=0).astype(jnp.bfloat16)

    def pad_b(b):
        b = b.reshape(1, -1)
        out = jnp.zeros((1, LANE), jnp.float32)
        return out.at[:, :b.shape[1]].set(b)

    b_pack = jnp.concatenate(
        [pad_b(params["b1"]), pad_b(params["b2"]), pad_b(params["b3"])], axis=1)
    return {"w1": w1, "w23": w23, "b": b_pack}


def _choose_tb(b_pad, tb_max):
    """Batch tile: big enough to amortize per-step overhead, small enough
    that medium/large batches produce >= 2 grid steps (v7x: both cores)."""
    if b_pad <= 32:
        return b_pad                               # single tiny block
    tb = min(tb_max, _round_up(pl.cdiv(b_pad, 2), 16))
    return max(16, tb)


# --------------------------------------------------------------------------
# Forward wrappers
# --------------------------------------------------------------------------
def policy_logits_padded(state, packed, *, tb=1024):
    """state: [B, S] f32.  Returns lane-padded logits [B_pad, 128] bf16.

    Columns action_size..127 are exactly 0.0 (NOT -inf): consumers must slice
    to [:, :action_size] before softmax/argmax.  Rows B..B_pad-1 are padding.
    """
    B, S = state.shape
    w1, w23, b_pack = packed["w1"], packed["w23"], packed["b"]
    assert w1.shape[0] == S, "state_size mismatch with packed params"

    # Pad the batch only to sublane granularity, and only when ragged.
    B_pad = _round_up(max(B, 16), 16)
    if B_pad != B:
        state = jnp.pad(state, ((0, B_pad - B), (0, 0)))

    TB = _choose_tb(B_pad, tb)
    grid = (pl.cdiv(B_pad, TB),)     # partial last block allowed

    flops = 2 * B_pad * HIDDEN_PAD * (S + 2 * HIDDEN_PAD)
    bytes_accessed = (B_pad * S * 4 + w1.size * 2 + w23.size * 2
                      + b_pack.size * 4 + B_pad * HIDDEN_PAD * 2)

    return pl.pallas_call(
        policy_mlp_kernel,
        out_shape=jax.ShapeDtypeStruct((B_pad, HIDDEN_PAD), jnp.bfloat16),
        grid=grid,
        in_specs=[
            pl.BlockSpec((TB, S), lambda i: (i, 0)),                  # state tile (f32)
            pl.BlockSpec((S, HIDDEN_PAD), lambda i: (0, 0)),          # resident fc1 W
            pl.BlockSpec((2 * HIDDEN_PAD, HIDDEN_PAD), lambda i: (0, 0)),  # fc2;fc3 slab
            pl.BlockSpec((1, 3 * LANE), lambda i: (0, 0)),            # packed biases
        ],
        out_specs=pl.BlockSpec((TB, HIDDEN_PAD), lambda i: (i, 0)),
        compiler_params=pltpu.CompilerParams(
            dimension_semantics=("parallel",)),
        cost_estimate=pl.CostEstimate(flops=flops, transcendentals=0,
                                      bytes_accessed=bytes_accessed),
    )(state, w1, w23, b_pack)


def policy_network_forward(state, packed, action_size, *, tb=1024):
    """Convenience wrapper: returns [B, action_size] f32 logits.

    For best end-to-end perf, consumers (softmax / log_prob) should instead
    take policy_logits_padded() output and read only the first A lanes.
    """
    B = state.shape[0]
    out = policy_logits_padded(state, packed, tb=tb)
    return out[:B, :action_size].astype(jnp.float32)


# --------------------------------------------------------------------------
# Init + pure-JAX reference
# --------------------------------------------------------------------------
def init_params(key, state_size, action_size, hidden=HIDDEN):
    """Deterministic init mimicking nn.Linear (uniform +/- 1/sqrt(fan_in)).
    Weights stored [in, out] so the kernel computes x @ W + b."""
    ks = jax.random.split(key, 6)

    def linear(kw, kb, fan_in, fan_out):
        bound = 1.0 / jnp.sqrt(jnp.float32(fan_in))
        w = jax.random.uniform(kw, (fan_in, fan_out), jnp.float32, -bound, bound)
        b = jax.random.uniform(kb, (1, fan_out), jnp.float32, -bound, bound)
        return w, b

    w1, b1 = linear(ks[0], ks[1], state_size, hidden)
    w2, b2 = linear(ks[2], ks[3], hidden, hidden)
    w3, b3 = linear(ks[4], ks[5], hidden, action_size)
    return {"w1": w1, "b1": b1, "w2": w2, "b2": b2, "w3": w3, "b3": b3}


def policy_network_ref(state, p):
    """Pure-JAX f32 reference for correctness check."""
    h1 = jnp.maximum(state @ p["w1"] + p["b1"], 0.0)
    h2 = jnp.maximum(h1 @ p["w2"] + p["b2"], 0.0)
    return h2 @ p["w3"] + p["b3"]


if __name__ == "__main__":
    key = jax.random.PRNGKey(0)
    k_state, k_params = jax.random.split(key)

    batch = 8
    state_size = 16
    action_size = 8

    state = jax.random.normal(k_state, (batch, state_size), jnp.float32)
    params = init_params(k_params, state_size, action_size)
    packed = pack_params(params)          # hoisted out of the per-call path

    logits = policy_network_forward(state, packed, action_size)
    jax.block_until_ready(logits)

    ref = policy_network_ref(state, params)
    assert logits.shape == (batch, action_size)
    # bf16 matmul operands + bf16 output -> small drift vs the f32 reference.
    assert jnp.allclose(logits, ref, atol=5e-2, rtol=5e-2), "mismatch vs ref"

    # TODO(synk): get_action (Categorical sample / log_prob / entropy) is
    # host-side sampling logic, not part of the forward hot path; not kernelized.
    print("KERNEL_OK")
</pallas_src>

<mosaic_0001>
module attributes {stable_mosaic.version = 11 : i64} {
  func.func @policy_mlp_kernel(%arg0: i32, %arg1: memref<16x16xf32, #tpu.memory_space<vmem>>, %arg2: memref<16x128xbf16, #tpu.memory_space<vmem>>, %arg3: memref<256x128xbf16, #tpu.memory_space<vmem>>, %arg4: memref<1x384xf32, #tpu.memory_space<vmem>>, %arg5: memref<16x128xbf16, #tpu.memory_space<vmem>>) attributes {dimension_semantics = [#tpu.dimension_semantics<parallel>], iteration_bounds = array<i64: 1>, scalar_prefetch = 0 : i64, scratch_operands = 0 : i64, tpu.core_type = #tpu.core_type<tc>, window_params = [{transform_indices = @transform_0, window_bounds = array<i64: 16, 16>}, {pipeline_mode = #tpu.pipeline_mode<synchronous>, transform_indices = @transform_1, window_bounds = array<i64: 16, 128>}, {pipeline_mode = #tpu.pipeline_mode<synchronous>, transform_indices = @transform_2, window_bounds = array<i64: 256, 128>}, {pipeline_mode = #tpu.pipeline_mode<synchronous>, transform_indices = @transform_3, window_bounds = array<i64: 1, 384>}, {transform_indices = @transform_4, window_bounds = array<i64: 16, 128>}]} {
    %c0 = arith.constant 0 : index
    %c0_0 = arith.constant 0 : index
    %0 = vector.load %arg1[%c0, %c0_0] : memref<16x16xf32, #tpu.memory_space<vmem>>, vector<16x16xf32>
    %1 = arith.truncf %0 : vector<16x16xf32> to vector<16x16xbf16>
    %c0_1 = arith.constant 0 : index
    %c0_2 = arith.constant 0 : index
    %2 = vector.load %arg2[%c0_1, %c0_2] : memref<16x128xbf16, #tpu.memory_space<vmem>>, vector<16x128xbf16>
    %c0_3 = arith.constant 0 : index
    %c0_4 = arith.constant 0 : index
    %3 = vector.load %arg3[%c0_3, %c0_4] : memref<256x128xbf16, #tpu.memory_space<vmem>>, vector<128x128xbf16>
    %c128 = arith.constant 128 : index
    %c0_5 = arith.constant 0 : index
    %4 = vector.load %arg3[%c128, %c0_5] : memref<256x128xbf16, #tpu.memory_space<vmem>>, vector<128x128xbf16>
    %c0_6 = arith.constant 0 : index
    %c0_7 = arith.constant 0 : index
    %5 = vector.load %arg4[%c0_6, %c0_7] : memref<1x384xf32, #tpu.memory_space<vmem>>, vector<1x128xf32>
    %c0_8 = arith.constant 0 : index
    %c128_9 = arith.constant 128 : index
    %6 = vector.load %arg4[%c0_8, %c128_9] : memref<1x384xf32, #tpu.memory_space<vmem>>, vector<1x128xf32>
    %c0_10 = arith.constant 0 : index
    %c256 = arith.constant 256 : index
    %7 = vector.load %arg4[%c0_10, %c256] : memref<1x384xf32, #tpu.memory_space<vmem>>, vector<1x128xf32>
    %cst = arith.constant dense<0.000000e+00> : vector<16x128xf32>
    %8 = tpu.matmul %1, %2, %cst {dimension_numbers = #tpu.dot_dimension_numbers<[1], [0], [0], [1], [0, 0, 1, 1], [], []>} : vector<16x16xbf16>, vector<16x128xbf16>, vector<16x128xf32> -> vector<16x128xf32>
    %9 = vector.broadcast %5 : vector<1x128xf32> to vector<16x128xf32>
    %10 = arith.addf %8, %9 : vector<16x128xf32>
    %cst_11 = arith.constant 0.000000e+00 : f32
    %11 = vector.broadcast %cst_11 : f32 to vector<16x128xf32>
    %12 = arith.maximumf %10, %11 : vector<16x128xf32>
    %13 = arith.truncf %12 : vector<16x128xf32> to vector<16x128xbf16>
    %cst_12 = arith.constant dense<0.000000e+00> : vector<16x128xf32>
    %14 = tpu.matmul %13, %3, %cst_12 {dimension_numbers = #tpu.dot_dimension_numbers<[1], [0], [0], [1], [0, 0, 1, 1], [], []>} : vector<16x128xbf16>, vector<128x128xbf16>, vector<16x128xf32> -> vector<16x128xf32>
    %15 = vector.broadcast %6 : vector<1x128xf32> to vector<16x128xf32>
    %16 = arith.addf %14, %15 : vector<16x128xf32>
    %cst_13 = arith.constant 0.000000e+00 : f32
    %17 = vector.broadcast %cst_13 : f32 to vector<16x128xf32>
    %18 = arith.maximumf %16, %17 : vector<16x128xf32>
    %19 = arith.truncf %18 : vector<16x128xf32> to vector<16x128xbf16>
    %cst_14 = arith.constant dense<0.000000e+00> : vector<16x128xf32>
    %20 = tpu.matmul %19, %4, %cst_14 {dimension_numbers = #tpu.dot_dimension_numbers<[1], [0], [0], [1], [0, 0, 1, 1], [], []>} : vector<16x128xbf16>, vector<128x128xbf16>, vector<16x128xf32> -> vector<16x128xf32>
    %21 = vector.broadcast %7 : vector<1x128xf32> to vector<16x128xf32>
    %22 = arith.addf %20, %21 : vector<16x128xf32>
    %23 = arith.truncf %22 : vector<16x128xf32> to vector<16x128xbf16>
    %c0_15 = arith.constant 0 : index
    %c0_16 = arith.constant 0 : index
    %24 = vector.load %arg5[%c0_15, %c0_16] : memref<16x128xbf16, #tpu.memory_space<vmem>>, vector<16x128xbf16>
    tpu.vector_store %arg5[%c0_15, %c0_16], %23 {strides = array<i32>} : memref<16x128xbf16, #tpu.memory_space<vmem>>, vector<16x128xbf16>,
    return
  }
  func.func @transform_0(%arg0: i32) -> (i32, i32) {
    %c0_i32 = arith.constant 0 : i32
    %c0_i32_0 = arith.constant 0 : i32
    return %arg0, %c0_i32 : i32, i32
  }
  func.func @transform_1(%arg0: i32) -> (i32, i32) {
    %c0_i32 = arith.constant 0 : i32
    %c0_i32_0 = arith.constant 0 : i32
    %c0_i32_1 = arith.constant 0 : i32
    return %c0_i32, %c0_i32_0 : i32, i32
  }
  func.func @transform_2(%arg0: i32) -> (i32, i32) {
    %c0_i32 = arith.constant 0 : i32
    %c0_i32_0 = arith.constant 0 : i32
    %c0_i32_1 = arith.constant 0 : i32
    return %c0_i32, %c0_i32_0 : i32, i32
  }
  func.func @transform_3(%arg0: i32) -> (i32, i32) {
    %c0_i32 = arith.constant 0 : i32
    %c0_i32_0 = arith.constant 0 : i32
    %c0_i32_1 = arith.constant 0 : i32
    return %c0_i32, %c0_i32_0 : i32, i32
  }
  func.func @transform_4(%arg0: i32) -> (i32, i32) {
    %c0_i32 = arith.constant 0 : i32
    %c0_i32_0 = arith.constant 0 : i32
    return %arg0, %c0_i32 : i32, i32
  }
}

</mosaic_0001>

<bundles_post_ra>
// kernel: tpu_custom_call.1
= control target key start
LH: loop header
LB: loop body
LE: loop exit
PB: predicated region body
PF: predicated region fallthrough
CT: control target
= control target key end

     0   :  { %9 = vsyncpa [#allocation3], 0  ;;  %s722_s0 = inlined_call_operand.hbm [shape: f32[16,16], index: 0, kind: input, shape index: {}]   ;;  %s723_s1 = inlined_call_operand.hbm [shape: bf16[16,128], index: 1, kind: input, shape index: {}]   ;;  %s724_s2 = inlined_call_operand.hbm [shape: bf16[256,128], index: 2, kind: input, shape index: {}]   ;;  %s725_s3 = inlined_call_operand.vmem [shape: f32[1,384], index: 3, kind: input, shape index: {}]   ;;  %s726_s4 = inlined_call_operand.hbm [shape: bf16[16,128], index: 4, kind: output, shape index: {}]  }
   0x1   :  { %10 = vsyncpa [#allocation6], 0 }
   0x2   :  { %11 = vsyncpa [#allocation4], 0  ;;  %s598_s15 = smov [#allocation5]   ;;  %s504_s19 = scalar_lea.hbm %s723_s1, 128 }
   0x3   :  { %s29_s16 = sshll.u32 %s598_s15, 4  ;;  %p505_p0 = scmp.ne.s32.totalorder %s723_s1, %s504_s19  ;;  %s30_s16 = int_to_ptr.vmem [resolvable:$true] %s29_s16 }
   0x4   :  { %p508_p1 = scmp.lt.u32.totalorder %s504_s19, %s723_s1 }
   0x6   :  { %p510_p2 = pnand %p508_p1, %p505_p0 }
   0x8   :  { %513 = shalt.err (!%p510_p2)
}
   0x9   :  { %s514_s24 = scalar_lea.vmem %s30_s16, 128  ;;  %p519_p4 = scmp.lt.s32.totalorder %s30_s16, %s30_s16 }
   0xa   :  { %p515_p3 = scmp.ne.s32.totalorder %s30_s16, %s514_s24  ;;  %p520_p5 = scmp.lt.s32.totalorder %s514_s24, %s514_s24 }
   0xc   :  { %p521_p6 = por %p520_p5, %p519_p4 }
   0xe   :  { %p522_p7 = pnand %p521_p6, %p515_p3 }
  0x10   :  { %525 = shalt.err (!%p522_p7)
}
  0x11   :  { %s599_s25 = smov 64   ;;  %s600_s26 = smov 4  }
  0x12   :  { %35 = dma.hbm_to_vmem [thread:$0]  %s723_s1, 128, %s30_s16, [#allocation6], %s599_s25, %s599_s25, %s600_s26  }
  0x13   :  { %s601_s29 = smov [#allocation2]   ;;  %s526_s7 = scalar_lea.hbm %s722_s0, 256 }
  0x14   :  { %s17_s30 = sshll.u32 %s601_s29, 4  ;;  %p527_p8 = scmp.ne.s32.totalorder %s722_s0, %s526_s7  ;;  %s18_s30 = int_to_ptr.vmem [resolvable:$true] %s17_s30 }
  0x15   :  { %p530_p9 = scmp.lt.u32.totalorder %s526_s7, %s722_s0 }
  0x17   :  { %p532_p10 = pnand %p530_p9, %p527_p8 }
  0x19   :  { %535 = shalt.err (!%p532_p10)
}
  0x1a   :  { %s536_s12 = scalar_lea.vmem %s18_s30, 256  ;;  %p541_p12 = scmp.lt.s32.totalorder %s18_s30, %s18_s30 }
  0x1b   :  { %p537_p11 = scmp.ne.s32.totalorder %s18_s30, %s536_s12  ;;  %p542_p13 = scmp.lt.s32.totalorder %s536_s12, %s536_s12 }
  0x1d   :  { %p543_p0 = por %p542_p13, %p541_p12 }
  0x1f   :  { %p544_p1 = pnand %p543_p0, %p537_p11 }
  0x21   :  { %547 = shalt.err (!%p544_p1)
}
  0x22   :  { %s602_s1 = smov 128   ;;  %s603_s13 = smov 8  }
  0x23   :  { %23 = dma.hbm_to_vmem [thread:$0]  %s722_s0, 256, %s18_s30, [#allocation3], %s602_s1, %s602_s1, %s603_s13  }
  0x24   :  { %s604_s16 = smov [#allocation7]   ;;  %s548_s20 = scalar_lea.hbm %s724_s2, 2048 }
  0x25   :  { %s41_s17 = sshll.u32 %s604_s16, 4  ;;  %p549_p2 = scmp.ne.s32.totalorder %s724_s2, %s548_s20  ;;  %s42_s17 = int_to_ptr.vmem [resolvable:$true] %s41_s17 }
  0x26   :  { %p552_p3 = scmp.lt.u32.totalorder %s548_s20, %s724_s2 }
  0x28   :  { %p554_p4 = pnand %p552_p3, %p549_p2 }
  0x2a   :  { %557 = shalt.err (!%p554_p4)
}
  0x2b   :  { %s558_s27 = scalar_lea.vmem %s42_s17, 2048  ;;  %p563_p6 = scmp.lt.s32.totalorder %s42_s17, %s42_s17 }
  0x2c   :  { %p559_p5 = scmp.ne.s32.totalorder %s42_s17, %s558_s27  ;;  %p564_p7 = scmp.lt.s32.totalorder %s558_s27, %s558_s27 }
  0x2e   :  { %p565_p8 = por %p564_p7, %p563_p6 }
  0x30   :  { %p566_p9 = pnand %p565_p8, %p559_p5 }
  0x32   :  { %569 = shalt.err (!%p566_p9)
}
  0x33   :  { %47 = dma.hbm_to_vmem [thread:$0]  %s724_s2, 2048, %s42_s17, [#allocation6], %s599_s25, %s599_s25, %s600_s26  }
  0x34   :  { %592 = dma.done.wait [#allocation3], 256  }
  0x35   :  { %593 = vsyncadd [#allocation3], 4294967040 }
  0x36   :  { %594 = dma.done.wait [#allocation6], 2176  }
  0x37   :  { %595 = vsyncadd [#allocation6], 4294965120  ;;  %v605_v0 = vmov 0.0   ;;  %vm606_vm0 = vmmov 0   ;;  %v487_v1 = vld [vmem:[#allocation5] sm:$0xff]   ;;  %v60_v2 = vld [vmem:[#allocation2] sm:$0xff] }
  0x38   :  { %431 = vmatprep.subr.bf16.mxu0 %v605_v0  ;;  %433 = vmatprep.mubr.msk.bf16.mxu0 %vm606_vm0, %v605_v0  ;;  %v61_v3 = vld [vmem:[#allocation2 + $0x8] sm:$0xff]  ;;  %vm112_vm1 = vcmask 130048   ;;  %v488_v5 = vld [vmem:[#allocation7] sm:$0xff]   ;;  %v489_v6 = vld [vmem:[#allocation7 + $0x8] sm:$0xff]   ;;  %s607_s8 = smov [#allocation8]  }
  0x39   :  { %437 = vmatprep.subr.bf16.mxu1 %v605_v0  ;;  %453 = vmatprep.mubr.msk.bf16.mxu1 %vm606_vm0, %v605_v0  ;;  %v62_v4 = vpack.c.bf16 %v61_v3, %v60_v2  ;;  %v490_v7 = vld [vmem:[#allocation7 + $0x10] sm:$0xff]   ;;  %v491_v8 = vld [vmem:[#allocation7 + $0x18] sm:$0xff]   ;;  %v492_v9 = vld [vmem:[#allocation7 + $0x20] sm:$0xff]   ;;  %s368_s9 = sshll.u32 %s607_s8, 4  ;;  %s369_s9 = int_to_ptr.vmem [resolvable:$true] %s368_s9 }
  0x3a   :  { %432 = vmatpush3.bf16.msra.mxu0 %v487_v1  ;;  %438 = vmatpush3.bf16.msra.mxu1 %v488_v5  ;;  %v493_v10 = vld [vmem:[#allocation7 + $0x28] sm:$0xff]   ;;  %v494_v11 = vld [vmem:[#allocation7 + $0x30] sm:$0xff]   ;;  %v495_v12 = vld [vmem:[#allocation7 + $0x38] sm:$0xff]   ;;  %s570_s10 = scalar_lea.vmem %s369_s9, 128  ;;  %p575_p11 = scmp.lt.s32.totalorder %s369_s9, %s369_s9 }
  0x3b   :  { %457 = vmatprep.subr.bf16.mxu0 %v605_v0  ;;  %439 = vmatprep.subr.bf16.mxu1 %v605_v0  ;;  %v496_v13 = vld [vmem:[#allocation7 + $0x40] sm:$0xff]   ;;  %v497_v14 = vld [vmem:[#allocation7 + $0x48] sm:$0xff]   ;;  %v498_v15 = vld [vmem:[#allocation7 + $0x50] sm:$0xff]   ;;  %p571_p10 = scmp.ne.s32.totalorder %s369_s9, %s570_s10  ;;  %p576_p12 = scmp.lt.s32.totalorder %s570_s10, %s570_s10 }
  0x3c   :  { %v499_v16 = vld [vmem:[#allocation7 + $0x58] sm:$0xff]   ;;  %v500_v17 = vld [vmem:[#allocation7 + $0x60] sm:$0xff]   ;;  %v501_v18 = vld [vmem:[#allocation7 + $0x68] sm:$0xff]  }
  0x3d   :  { %434 = vmatmul.mubr.msk.bf16.vlgmr.msra.gmra.mrb[0].mxu0 %vm112_vm1, %v62_v4  ;;  %v381_v19 = vld [vmem:[%s725_s3] ss:$0 sm:$0xff]  ;;  %v502_v29 = vld [vmem:[#allocation7 + $0x70] sm:$0xff]   ;;  %v503_v30 = vld [vmem:[#allocation7 + $0x78] sm:$0xff]   ;;  %p577_p13 = por %p576_p12, %p575_p11 }
  0x3e   :  { %473 = vmatprep.mubr.msk.bf16.mxu0 %vm606_vm0, %v605_v0  ;;  %440 = vmatpush3.bf16.msra.mxu1 %v489_v6  ;;  %v384_v31 = vld [vmem:[%s725_s3 + $0x1] ss:$0 sm:$0xff]  ;;  %v393_v41 = vld [vmem:[%s725_s3 + $0x2] ss:$0 sm:$0xff] }
  0x3f   :  { %441 = vmatprep.subr.bf16.mxu1 %v605_v0  ;;  %458 = vmatpush3.bf16.msra.mxu0 %v496_v13  ;;  %p578_p0 = pnand %p577_p13, %p571_p10 }
  0x40   :  { %459 = vmatprep.subr.bf16.mxu0 %v605_v0 }
  0x42   :  { %442 = vmatpush3.bf16.msra.mxu1 %v490_v7 }
  0x43   :  { %443 = vmatprep.subr.bf16.mxu1 %v605_v0  ;;  %460 = vmatpush3.bf16.msra.mxu0 %v497_v14 }
  0x44   :  { %461 = vmatprep.subr.bf16.mxu0 %v605_v0 }
  0x46   :  { %444 = vmatpush3.bf16.msra.mxu1 %v491_v8 }
  0x47   :  { %445 = vmatprep.subr.bf16.mxu1 %v605_v0  ;;  %462 = vmatpush3.bf16.msra.mxu0 %v498_v15 }
  0x48   :  { %463 = vmatprep.subr.bf16.mxu0 %v605_v0 }
  0x4a   :  { %446 = vmatpush3.bf16.msra.mxu1 %v492_v9 }
  0x4b   :  { %447 = vmatprep.subr.bf16.mxu1 %v605_v0  ;;  %464 = vmatpush3.bf16.msra.mxu0 %v499_v16 }
  0x4c   :  { %465 = vmatprep.subr.bf16.mxu0 %v605_v0 }
  0x4e   :  { %448 = vmatpush3.bf16.msra.mxu1 %v493_v10 }
  0x4f   :  { %449 = vmatprep.subr.bf16.mxu1 %v605_v0  ;;  %466 = vmatpush3.bf16.msra.mxu0 %v500_v17 }
  0x50   :  { %467 = vmatprep.subr.bf16.mxu0 %v605_v0 }
  0x52   :  { %450 = vmatpush3.bf16.msra.mxu1 %v494_v11 }
  0x53   :  { %451 = vmatprep.subr.bf16.mxu1 %v605_v0  ;;  %468 = vmatpush3.bf16.msra.mxu0 %v501_v18 }
  0x54   :  { %469 = vmatprep.subr.bf16.mxu0 %v605_v0 }
  0x56   :  { %452 = vmatpush3.bf16.msra.mxu1 %v495_v12 }
  0x57   :  { %470 = vmatpush3.bf16.msra.mxu0 %v502_v29 }
  0x58   :  { %471 = vmatprep.subr.bf16.mxu0 %v605_v0 }
  0x5b   :  { %472 = vmatpush3.bf16.msra.mxu0 %v503_v30 }
 0x110   :  { %v150_v20 = vpop.f32.mrb[0].mxu0 }
 0x111   :  { %v151_v21 = vadd.f32 %v381_v19, %v150_v20  ;;  %v435_v22 = vpop.f32.mrb[1].mxu0 }
 0x112   :  { %v153_v23 = vpop.f32.mrb[2].mxu0 }
 0x113   :  { %v154_v24 = vadd.f32 %v381_v19, %v153_v23  ;;  %v436_v25 = vpop.f32.mrb[3].mxu0  ;;  %v157_v26 = vmax.f32 %v151_v21, 0.0 }
 0x115   :  { %v158_v27 = vmax.f32 %v154_v24, 0.0 }
 0x117   :  { %v159_v28 = vpack.c.bf16 %v158_v27, %v157_v26 }
 0x119   :  { %454 = vmatmul.mubr.bf16.vlgmr.msra.gmra.mrb[0].mxu1 %v159_v28 }
 0x1ec   :  { %v248_v32 = vpop.f32.mrb[0].mxu1 }
 0x1ed   :  { %v249_v33 = vadd.f32 %v384_v31, %v248_v32  ;;  %v455_v34 = vpop.f32.mrb[1].mxu1 }
 0x1ee   :  { %v251_v35 = vpop.f32.mrb[2].mxu1 }
 0x1ef   :  { %v252_v36 = vadd.f32 %v384_v31, %v251_v35  ;;  %v456_v37 = vpop.f32.mrb[3].mxu1  ;;  %v255_v38 = vmax.f32 %v249_v33, 0.0 }
 0x1f1   :  { %v256_v39 = vmax.f32 %v252_v36, 0.0 }
 0x1f3   :  { %v257_v40 = vpack.c.bf16 %v256_v39, %v255_v38 }
 0x1f5   :  { %474 = vmatmul.mubr.bf16.vlgmr.msra.gmra.mrb[4].mxu0 %v257_v40 }
 0x2c8   :  { %v346_v42 = vpop.f32.mrb[4].mxu0 }
 0x2c9   :  { %v475_v43 = vpop.f32.mrb[5].mxu0  ;;  %v347_v45 = vadd.f32 %v393_v41, %v346_v42 }
 0x2ca   :  { %v349_v44 = vpop.f32.mrb[6].mxu0 }
 0x2cb   :  { %v350_v46 = vadd.f32 %v393_v41, %v349_v44  ;;  %v476_v47 = vpop.f32.mrb[7].mxu0 }
 0x2cd   :  { %v409_v48 = vpack.c.bf16 %v350_v46, %v347_v45 }
 0x2cf   :  { %410 = vst [vmem:[#allocation8] sm:$0xff] %v409_v48  }
 0x2d0   :  { %581 = shalt.err (!%p578_p0)
}
 0x2d1   :  { %s582_s12 = scalar_lea.hbm %s726_s4, 128 }
 0x2d2   :  { %p583_p1 = scmp.ne.s32.totalorder %s726_s4, %s582_s12  ;;  %p586_p2 = scmp.lt.u32.totalorder %s582_s12, %s726_s4 }
 0x2d4   :  { %p588_p3 = pnand %p586_p2, %p583_p1 }
 0x2d6   :  { %591 = shalt.err (!%p588_p3)
}
 0x2d7   :  { %374 = dma.vmem_to_hbm [thread:$0]  %s369_s9, 128, %s726_s4, [#allocation4], %s599_s25, %s599_s25, %s600_s26  }
 0x2d8   :  { %596 = dma.done.wait [#allocation4], 128  }
 0x2d9   :  { %597 = vsyncadd [#allocation4], 4294967168 }
 0x2da   :  { %378 = vsyncpa [#allocation3], 1 }
 0x2db   :  { %379 = vsyncpa [#allocation6], 1 }
 0x2dc   :  { %380 = vsyncpa [#allocation4], 1 }

</bundles_post_ra>
